<compile_context>
chip_gen: v7x
topology: tpu7x:2x2x1
jax: 0.10.0
libtpu: 0.0.40
codegen_flags: <defaults>
</compile_context>

<pallas_src>
import functools

import jax
import jax.numpy as jnp
from jax.experimental import pallas as pl
from jax.experimental.pallas import tpu as pltpu

FEAT_PAD = 128      # node-feature width (100) padded lane-dense
HID_PAD = 128       # encoder hidden (32) / head (10) slab width, lane-dense
HEAD_DIM = 10       # nn.Linear(100, 10) heads (fc / fd)
NEG_BIAS = -30.0    # sigmoid(-30) ~ 9e-14: padded fc/fd bias columns contribute
                    # ~0 to the concat-add without any iota/where masking


# ----------------------------------------------------------------------------
# small helpers
# ----------------------------------------------------------------------------

def _round_up(x, m):
    return ((x + m - 1) // m) * m


def _full_spec(shape):
    nd = len(shape)
    return pl.BlockSpec(shape, lambda *_: (0,) * nd)


# ----------------------------------------------------------------------------
# Kernel 1: drug-atom GCN + per-drug mean pooling   (feat(), drug branch)
#   drug_feat = diag(1/cnt) @ P_onehot @ relu(A_drug @ (X_atom @ W_atom) + b)
#   grid over row tiles of A; X@W cached in VMEM scratch; pooled accumulator.
# ----------------------------------------------------------------------------

def _drug_feat_kernel(x_ref, w_ref, b_ref, cnt_ref, a_ref, p_ref, o_ref,
                      xw_ref, acc_ref):
    r = pl.program_id(0)

    @pl.when(r == 0)
    def _():
        xw_ref[...] = jnp.dot(
            x_ref[...], w_ref[...],
            preferred_element_type=jnp.float32).astype(jnp.bfloat16)
        acc_ref[...] = jnp.zeros_like(acc_ref)

    h = jnp.maximum(
        jnp.dot(a_ref[...], xw_ref[...], preferred_element_type=jnp.float32)
        + b_ref[...], 0.0)
    # bf16 pooling matmul (binary one-hot P is exact in bf16)
    acc_ref[...] += jnp.dot(p_ref[...], h.astype(jnp.bfloat16),
                            preferred_element_type=jnp.float32)

    @pl.when(r == pl.num_programs(0) - 1)
    def _():
        o_ref[...] = acc_ref[...] * cnt_ref[...]       # f32 mean scaling


def pallas_drug_feat(drug_a, drug_x, w_atom, b_atom, ibatch, n_drugs,
                     *, nd_pad, tr_target=256):
    n_atoms, atom_dim = drug_x.shape
    ad_pad = _round_up(atom_dim, 128)
    n_atoms8 = _round_up(n_atoms, 8)
    if n_atoms8 <= tr_target:
        tr, nr, na_pad = n_atoms8, 1, n_atoms8
    else:
        tr = tr_target                                 # multiple of 128
        na_pad = _round_up(n_atoms, tr)
        nr = na_pad // tr

    a_p = jnp.pad(drug_a.astype(jnp.bfloat16),
                  ((0, na_pad - n_atoms), (0, na_pad - n_atoms)))
    x_p = jnp.pad(drug_x.astype(jnp.bfloat16),
                  ((0, na_pad - n_atoms), (0, ad_pad - atom_dim)))
    w_p = jnp.pad(w_atom.astype(jnp.bfloat16),
                  ((0, ad_pad - atom_dim), (0, FEAT_PAD - w_atom.shape[1])))
    b_p = jnp.pad(b_atom.astype(jnp.float32)[None, :],
                  ((0, 0), (0, FEAT_PAD - b_atom.shape[0])))

    # binary scatter matrix (n_drugs_pad, n_atoms_pad); mean via 1/count in f32
    pool = jax.nn.one_hot(ibatch, n_drugs, dtype=jnp.bfloat16).T
    pool = jnp.pad(pool, ((0, nd_pad - n_drugs), (0, na_pad - n_atoms)))
    counts = jnp.sum(jax.nn.one_hot(ibatch, n_drugs, dtype=jnp.float32), axis=0)
    inv_cnt = jnp.pad(1.0 / jnp.maximum(counts, 1.0), (0, nd_pad - n_drugs))
    inv_cnt = inv_cnt[:, None]

    return pl.pallas_call(
        _drug_feat_kernel,
        out_shape=jax.ShapeDtypeStruct((nd_pad, FEAT_PAD), jnp.float32),
        grid=(nr,),
        in_specs=[pl.BlockSpec((na_pad, ad_pad), lambda r: (0, 0)),
                  pl.BlockSpec((ad_pad, FEAT_PAD), lambda r: (0, 0)),
                  pl.BlockSpec((1, FEAT_PAD), lambda r: (0, 0)),
                  pl.BlockSpec((nd_pad, 1), lambda r: (0, 0)),
                  pl.BlockSpec((tr, na_pad), lambda r: (r, 0)),
                  pl.BlockSpec((nd_pad, tr), lambda r: (0, r))],
        out_specs=pl.BlockSpec((nd_pad, FEAT_PAD), lambda r: (0, 0)),
        scratch_shapes=[pltpu.VMEM((na_pad, FEAT_PAD), jnp.bfloat16),
                        pltpu.VMEM((nd_pad, FEAT_PAD), jnp.float32)],
        compiler_params=pltpu.CompilerParams(
            dimension_semantics=("arbitrary",),
            vmem_limit_bytes=48 * 1024 * 1024),
    )(x_p, w_p, b_p, inv_cnt, a_p, pool)


# ----------------------------------------------------------------------------
# Kernel 2: omics linear + bias + relu              (feat(), cell branch)
#   grid = (M tiles [parallel], K tiles [arbitrary]); VMEM f32 accumulator.
# ----------------------------------------------------------------------------

def _cell_feat_kernel(a_ref, w_ref, b_ref, o_ref, acc_ref):
    k = pl.program_id(1)

    @pl.when(k == 0)
    def _():
        acc_ref[...] = jnp.zeros_like(acc_ref)

    acc_ref[...] += jnp.dot(a_ref[...], w_ref[...],
                            preferred_element_type=jnp.float32)

    @pl.when(k == pl.num_programs(1) - 1)
    def _():
        o_ref[...] = jnp.maximum(acc_ref[...] + b_ref[...], 0.0)


def pallas_cell_feat(omics, w_cell, b_cell, *, out_rows, tk=2048, tm=256):
    m, k_dim = omics.shape
    n_out = w_cell.shape[1]
    if out_rows <= 2 * tm:
        tm_eff, m_pad, nm = out_rows, out_rows, 1
    else:
        tm_eff = tm
        m_pad = _round_up(out_rows, tm)
        nm = m_pad // tm
    if k_dim <= tk:
        tk_eff = _round_up(k_dim, 128)
        k_p, nk = tk_eff, 1
    else:
        tk_eff = tk
        k_p = _round_up(k_dim, tk)
        nk = k_p // tk

    # pad in bf16 directly (no f32 intermediate pass over the big omics array)
    a_p = jnp.pad(omics.astype(jnp.bfloat16),
                  ((0, m_pad - m), (0, k_p - k_dim)))
    w_p = jnp.pad(w_cell.astype(jnp.bfloat16),
                  ((0, k_p - k_dim), (0, FEAT_PAD - n_out)))
    b_p = jnp.pad(b_cell.astype(jnp.float32)[None, :],
                  ((0, 0), (0, FEAT_PAD - n_out)))

    out = pl.pallas_call(
        _cell_feat_kernel,
        out_shape=jax.ShapeDtypeStruct((m_pad, FEAT_PAD), jnp.float32),
        grid=(nm, nk),
        in_specs=[pl.BlockSpec((tm_eff, tk_eff), lambda i, k: (i, k)),
                  pl.BlockSpec((tk_eff, FEAT_PAD), lambda i, k: (k, 0)),
                  pl.BlockSpec((1, FEAT_PAD), lambda i, k: (0, 0))],
        out_specs=pl.BlockSpec((tm_eff, FEAT_PAD), lambda i, k: (i, 0)),
        scratch_shapes=[pltpu.VMEM((tm_eff, FEAT_PAD), jnp.float32)],
        compiler_params=pltpu.CompilerParams(
            dimension_semantics=("parallel", "arbitrary")),
    )(a_p, w_p, b_p)
    return out[:out_rows]


# ----------------------------------------------------------------------------
# Kernel 3: fused encoder (pos+neg) + summary + fc/fd heads + bilinear score
#   single N=384 MXU pass over [W_enc | W_fc | W_fd], masked-add concat via
#   -30 pre-biased fc/fd columns, lane-dense pos_adj output.
# ----------------------------------------------------------------------------

def _encoder_head_kernel(ap_ref, an_ref, f_ref, wall_ref, ball_ref, benc_ref,
                         mask_ref, zp_ref, zn_ref, sp_ref, sn_ref, adj_ref,
                         *, index_pad, inv_n):
    feat = f_ref[...]                                   # (n_pad, 128) bf16

    # one fused MXU pass: cols [0:128]=feat@W_enc, [128:256]=fc_pre, [256:384]=fd_pre
    allp = jnp.dot(feat, wall_ref[...],
                   preferred_element_type=jnp.float32) + ball_ref[...]
    xw_b = allp[:, :HID_PAD].astype(jnp.bfloat16)

    # encoder: relu(A @ (X@W_enc) + b); row mask zeroes padded node rows so the
    # masked-add concat below and the summary mean stay exact.
    mask = mask_ref[...]
    zp = mask * jnp.maximum(
        jnp.dot(ap_ref[...], xw_b, preferred_element_type=jnp.float32)
        + benc_ref[...], 0.0)
    zn = mask * jnp.maximum(
        jnp.dot(an_ref[...], xw_b, preferred_element_type=jnp.float32)
        + benc_ref[...], 0.0)
    zp_ref[...] = zp
    zn_ref[...] = zn

    # summary: sigmoid(mean(z over real nodes))
    sp_ref[...] = jax.nn.sigmoid(jnp.sum(zp, axis=0, keepdims=True) * inv_n)
    sn_ref[...] = jax.nn.sigmoid(jnp.sum(zn, axis=0, keepdims=True) * inv_n)

    # heads: fc/fd weights sit at column offset `hidden` inside their slab and
    # padded bias columns are -30, so torch.cat((pos_z, sigmoid(fc))) is a
    # plain add (zp columns >= hidden are exactly 0 by zero weight/bias padding).
    cellpos = zp[:index_pad] + jax.nn.sigmoid(
        allp[:index_pad, HID_PAD:2 * HID_PAD])
    drugpos = zp[index_pad:] + jax.nn.sigmoid(
        allp[index_pad:, 2 * HID_PAD:3 * HID_PAD])

    adj_ref[...] = jax.nn.sigmoid(
        jax.lax.dot_general(cellpos, drugpos,
                            dimension_numbers=(((1,), (1,)), ((), ())),
                            preferred_element_type=jnp.float32))


def pallas_encoder_head(a_pos, a_neg, feature_pad, w_all, b_all, b_enc_p,
                        row_mask, *, index_pad, nd_pad, n_real):
    n_pad = feature_pad.shape[0]
    flops = 2 * (n_pad * FEAT_PAD * 3 * HID_PAD + 2 * n_pad * n_pad * HID_PAD
                 + index_pad * HID_PAD * nd_pad)
    transcendentals = 2 * HID_PAD + 2 * n_pad * HID_PAD + index_pad * nd_pad
    bytes_accessed = (2 * (2 * n_pad * n_pad + n_pad * FEAT_PAD
                           + FEAT_PAD * 3 * HID_PAD)
                      + 4 * (2 * n_pad * HID_PAD + 2 * HID_PAD
                             + index_pad * nd_pad))
    kern = functools.partial(_encoder_head_kernel, index_pad=index_pad,
                             inv_n=1.0 / float(n_real))
    return pl.pallas_call(
        kern,
        out_shape=(jax.ShapeDtypeStruct((n_pad, HID_PAD), jnp.float32),   # pos_z
                   jax.ShapeDtypeStruct((n_pad, HID_PAD), jnp.float32),   # neg_z
                   jax.ShapeDtypeStruct((1, HID_PAD), jnp.float32),       # summary+
                   jax.ShapeDtypeStruct((1, HID_PAD), jnp.float32),       # summary-
                   jax.ShapeDtypeStruct((index_pad, nd_pad), jnp.float32)),
        grid=(1,),
        in_specs=[_full_spec((n_pad, n_pad)), _full_spec((n_pad, n_pad)),
                  _full_spec((n_pad, FEAT_PAD)),
                  _full_spec((FEAT_PAD, 3 * HID_PAD)),
                  _full_spec((1, 3 * HID_PAD)),
                  _full_spec((1, HID_PAD)),
                  _full_spec((n_pad, 1))],
        out_specs=(_full_spec((n_pad, HID_PAD)), _full_spec((n_pad, HID_PAD)),
                   _full_spec((1, HID_PAD)), _full_spec((1, HID_PAD)),
                   _full_spec((index_pad, nd_pad))),
        compiler_params=pltpu.CompilerParams(
            dimension_semantics=("arbitrary",)),
        cost_estimate=pl.CostEstimate(flops=int(flops),
                                      transcendentals=int(transcendentals),
                                      bytes_accessed=int(bytes_accessed)),
    )(a_pos.astype(jnp.bfloat16), a_neg.astype(jnp.bfloat16),
      feature_pad.astype(jnp.bfloat16),
      w_all.astype(jnp.bfloat16), b_all.astype(jnp.float32),
      b_enc_p.astype(jnp.float32), row_mask.astype(jnp.float32))


# ----------------------------------------------------------------------------
# Glue: adjacency construction (padded node layout), parameter init
# ----------------------------------------------------------------------------

def node_mask_vec(index, index_pad, n_drugs, nd_pad):
    return jnp.concatenate([
        jnp.ones((index,), jnp.float32),
        jnp.zeros((index_pad - index,), jnp.float32),
        jnp.ones((n_drugs,), jnp.float32),
        jnp.zeros((nd_pad - n_drugs,), jnp.float32)])


def build_norm_adj_from_edges(edge, index, index_pad, n_drugs, nd_pad, label):
    """Dense, symmetric, self-looped, GCN-normalized D^-1/2 (A+I) D^-1/2
    adjacency for edges carrying the given label, laid out on the padded node
    axis [cells(index_pad) | drugs(nd_pad)]; padded rows/cols stay zero."""
    n_pad = index_pad + nd_pad
    shift = index_pad - index
    src = edge[:, 0]
    dst = edge[:, 1]
    src_m = jnp.where(src >= index, src + shift, src)
    dst_m = jnp.where(dst >= index, dst + shift, dst)
    w = (edge[:, 2] == label).astype(jnp.float32)
    a = jnp.zeros((n_pad, n_pad), jnp.float32)
    a = a.at[src_m, dst_m].add(w)
    a = a.at[dst_m, src_m].add(w)
    a = jnp.minimum(a, 1.0)
    mask = node_mask_vec(index, index_pad, n_drugs, nd_pad)
    eye = jnp.eye(n_pad, dtype=jnp.float32)
    a = a * (1.0 - eye) + jnp.diag(mask)          # self-loops on real nodes only
    deg = a.sum(axis=1)
    dis = jnp.where(deg > 0.0, jax.lax.rsqrt(jnp.maximum(deg, 1e-12)), 0.0)
    return a * dis[:, None] * dis[None, :]


def build_drug_norm_adj(drug_adj):
    a = drug_adj.astype(jnp.float32)
    n = a.shape[0]
    a = jnp.minimum(a + a.T, 1.0)
    eye = jnp.eye(n, dtype=jnp.float32)
    a = a * (1.0 - eye) + eye                     # clean self-loops
    dis = jax.lax.rsqrt(jnp.maximum(a.sum(axis=1), 1e-12))
    return a * dis[:, None] * dis[None, :]


def glorot(key, shape):
    fan_in, fan_out = shape
    limit = (6.0 / (fan_in + fan_out)) ** 0.5
    return jax.random.uniform(key, shape, jnp.float32, -limit, limit)


def init_params(key, *, hidden, atom_dim, omics_dim):
    ks = jax.random.split(key, 8)
    return {
        # feat(): drug-atom GCN to 100-d, cell omics projection to 100-d
        "W_atom": glorot(ks[0], (atom_dim, 100)),
        "b_atom": jnp.zeros((100,), jnp.float32),
        "W_cell": glorot(ks[1], (omics_dim, 100)),
        "b_cell": jnp.zeros((100,), jnp.float32),
        # encoder(): one dense GCN layer 100 -> hidden
        "W_enc": glorot(ks[2], (100, hidden)),
        "b_enc": jnp.zeros((hidden,), jnp.float32),
        # GraphCDR.weight (bilinear discriminator; unused by forward())
        "weight": glorot(ks[3], (hidden, hidden)),
        # fc / fd: Linear(100, 10), xavier weights, zero bias
        "W_fc": glorot(ks[4], (100, 10)),
        "b_fc": jnp.zeros((10,), jnp.float32),
        "W_fd": glorot(ks[5], (100, 10)),
        "b_fd": jnp.zeros((10,), jnp.float32),
    }


# ----------------------------------------------------------------------------
# GraphCDR forward
# ----------------------------------------------------------------------------

def graphcdr_forward(params, drug_feature, drug_adj, ibatch,
                     mutation_data, gexpr_data, methylation_data, edge,
                     *, index, n_drugs, hidden):
    assert hidden + HEAD_DIM <= HID_PAD
    index_pad = _round_up(index, 16)        # tile-aligned cell block
    nd_pad = _round_up(n_drugs, 128)        # lane-dense drug block / adj output
    n_real = index + n_drugs

    # ---- feat(): drug branch -- tiled atom GCN + mean pooling --------------
    drug_a = build_drug_norm_adj(drug_adj)
    drug_feat_pad = pallas_drug_feat(drug_a, drug_feature, params["W_atom"],
                                     params["b_atom"], ibatch, n_drugs,
                                     nd_pad=nd_pad)            # (nd_pad, 128)

    # ---- feat(): cell branch -- omics concat -> K-tiled linear + relu ------
    omics = jnp.concatenate([mutation_data, gexpr_data, methylation_data],
                            axis=1)
    cell_feat_pad = pallas_cell_feat(omics, params["W_cell"], params["b_cell"],
                                     out_rows=index_pad)       # (index_pad,128)

    feature_pad = jnp.concatenate([cell_feat_pad, drug_feat_pad], axis=0)

    # ---- edge split into positive / negative normalized adjacencies --------
    a_pos = build_norm_adj_from_edges(edge, index, index_pad, n_drugs, nd_pad, 1)
    a_neg = build_norm_adj_from_edges(edge, index, index_pad, n_drugs, nd_pad, -1)
    row_mask = node_mask_vec(index, index_pad, n_drugs, nd_pad)[:, None]

    # ---- pack [W_enc | W_fc | W_fd] into one (128, 384) slab ----------------
    feat_dim = params["W_enc"].shape[0]                        # 100
    w_all = jnp.zeros((FEAT_PAD, 3 * HID_PAD), jnp.float32)
    w_all = w_all.at[:feat_dim, :hidden].set(params["W_enc"])
    w_all = w_all.at[:feat_dim,
                     HID_PAD + hidden:HID_PAD + hidden + HEAD_DIM
                     ].set(params["W_fc"])
    w_all = w_all.at[:feat_dim,
                     2 * HID_PAD + hidden:2 * HID_PAD + hidden + HEAD_DIM
                     ].set(params["W_fd"])
    b_all = jnp.full((1, 3 * HID_PAD), NEG_BIAS, jnp.float32)
    b_all = b_all.at[0, :HID_PAD].set(0.0)                     # enc bias added later
    b_all = b_all.at[0, HID_PAD + hidden:HID_PAD + hidden + HEAD_DIM
                     ].set(params["b_fc"])
    b_all = b_all.at[0, 2 * HID_PAD + hidden:2 * HID_PAD + hidden + HEAD_DIM
                     ].set(params["b_fd"])
    b_enc_p = jnp.pad(params["b_enc"][None, :],
                      ((0, 0), (0, HID_PAD - hidden)))

    # ---- fused encoder + summary + heads + bilinear score ------------------
    z_pos_p, z_neg_p, sum_pos_p, sum_neg_p, adj_p = pallas_encoder_head(
        a_pos, a_neg, feature_pad, w_all, b_all, b_enc_p, row_mask,
        index_pad=index_pad, nd_pad=nd_pad, n_real=n_real)

    pos_z = jnp.concatenate(
        [z_pos_p[:index, :hidden],
         z_pos_p[index_pad:index_pad + n_drugs, :hidden]], axis=0)
    neg_z = jnp.concatenate(
        [z_neg_p[:index, :hidden],
         z_neg_p[index_pad:index_pad + n_drugs, :hidden]], axis=0)
    summary_pos = sum_pos_p[0, :hidden]
    summary_neg = sum_neg_p[0, :hidden]
    pos_adj = adj_p[:index, :n_drugs].reshape(-1)

    # TODO(synk): discriminate()/loss() (z @ weight @ summary scoring) are not
    # part of forward(); params["weight"] is initialised but unused here.
    return pos_z, neg_z, summary_pos, summary_neg, pos_adj


# ----------------------------------------------------------------------------
# Demo
# ----------------------------------------------------------------------------

if __name__ == "__main__":
    key = jax.random.PRNGKey(0)

    hidden = 32          # hidden_channels
    index = 8            # number of cell-line nodes
    n_drugs = 8          # number of drug nodes
    n_nodes = index + n_drugs
    atoms_per_drug = 4
    n_atoms = n_drugs * atoms_per_drug
    atom_dim = 16
    mut_dim, gexpr_dim, methy_dim = 24, 16, 24

    ks = jax.random.split(key, 8)
    params = init_params(ks[0], hidden=hidden, atom_dim=atom_dim,
                         omics_dim=mut_dim + gexpr_dim + methy_dim)

    drug_feature = jax.random.normal(ks[1], (n_atoms, atom_dim), jnp.float32)
    drug_adj = (jax.random.uniform(ks[2], (n_atoms, n_atoms)) > 0.7
                ).astype(jnp.float32)
    ibatch = jnp.repeat(jnp.arange(n_drugs, dtype=jnp.int32), atoms_per_drug)

    mutation_data = jax.random.normal(ks[3], (index, mut_dim), jnp.float32)
    gexpr_data = jax.random.normal(ks[4], (index, gexpr_dim), jnp.float32)
    methylation_data = jax.random.normal(ks[5], (index, methy_dim), jnp.float32)

    # bipartite cell<->drug edges with labels +/-1
    cells = jnp.repeat(jnp.arange(index, dtype=jnp.int32), n_drugs)
    drugs = jnp.tile(jnp.arange(n_drugs, dtype=jnp.int32) + index, index)
    labels = jnp.where(
        jax.random.uniform(ks[6], (index * n_drugs,)) > 0.5, 1, -1
    ).astype(jnp.int32)
    edge = jnp.stack([cells, drugs, labels], axis=1)                 # (E, 3)

    outs = graphcdr_forward(params, drug_feature, drug_adj, ibatch,
                            mutation_data, gexpr_data, methylation_data, edge,
                            index=index, n_drugs=n_drugs, hidden=hidden)
    outs = jax.block_until_ready(outs)

    pos_z, neg_z, summary_pos, summary_neg, pos_adj = outs
    assert pos_z.shape == (n_nodes, hidden)
    assert neg_z.shape == (n_nodes, hidden)
    assert summary_pos.shape == (hidden,)
    assert summary_neg.shape == (hidden,)
    assert pos_adj.shape == (index * n_drugs,)
    assert bool(jnp.all(jnp.isfinite(pos_adj)))
    assert bool(jnp.all(jnp.isfinite(pos_z)))
    assert bool(jnp.all(jnp.isfinite(neg_z)))
    print("KERNEL_OK")
</pallas_src>

<mosaic_0001>
module attributes {stable_mosaic.version = 11 : i64} {
  func.func @_drug_feat_kernel(%arg0: i32, %arg1: memref<32x128xbf16, #tpu.memory_space<vmem>>, %arg2: memref<128x128xbf16, #tpu.memory_space<vmem>>, %arg3: memref<1x128xf32, #tpu.memory_space<vmem>>, %arg4: memref<128x1xf32, #tpu.memory_space<vmem>>, %arg5: memref<32x32xbf16, #tpu.memory_space<vmem>>, %arg6: memref<128x32xbf16, #tpu.memory_space<vmem>>, %arg7: memref<128x128xf32, #tpu.memory_space<vmem>>, %arg8: memref<32x128xbf16, #tpu.memory_space<vmem>>, %arg9: memref<128x128xf32, #tpu.memory_space<vmem>>) attributes {dimension_semantics = [#tpu.dimension_semantics<arbitrary>], iteration_bounds = array<i64: 1>, scalar_prefetch = 0 : i64, scratch_operands = 2 : i64, tpu.core_type = #tpu.core_type<tc>, window_params = [{pipeline_mode = #tpu.pipeline_mode<synchronous>, transform_indices = @transform_0, window_bounds = array<i64: 32, 128>}, {pipeline_mode = #tpu.pipeline_mode<synchronous>, transform_indices = @transform_1, window_bounds = array<i64: 128, 128>}, {pipeline_mode = #tpu.pipeline_mode<synchronous>, transform_indices = @transform_2, window_bounds = array<i64: 1, 128>}, {pipeline_mode = #tpu.pipeline_mode<synchronous>, transform_indices = @transform_3, window_bounds = array<i64: 128, 1>}, {transform_indices = @transform_4, window_bounds = array<i64: 32, 32>}, {transform_indices = @transform_5, window_bounds = array<i64: 128, 32>}, {pipeline_mode = #tpu.pipeline_mode<synchronous>, transform_indices = @transform_6, window_bounds = array<i64: 128, 128>}]} {
    %c0_i32 = arith.constant 0 : i32
    %0 = arith.cmpi eq, %arg0, %c0_i32 : i32
    %1 = arith.extui %0 : i1 to i32
    %c0_i32_0 = arith.constant 0 : i32
    %2 = arith.cmpi ne, %1, %c0_i32_0 : i32
    scf.if %2 {
      %c0_16 = arith.constant 0 : index
      %c0_17 = arith.constant 0 : index
      %20 = vector.load %arg1[%c0_16, %c0_17] : memref<32x128xbf16, #tpu.memory_space<vmem>>, vector<32x128xbf16>
      %c0_18 = arith.constant 0 : index
      %c0_19 = arith.constant 0 : index
      %21 = vector.load %arg2[%c0_18, %c0_19] : memref<128x128xbf16, #tpu.memory_space<vmem>>, vector<128x128xbf16>
      %cst_20 = arith.constant dense<0.000000e+00> : vector<32x128xf32>
      %22 = tpu.matmul %20, %21, %cst_20 {dimension_numbers = #tpu.dot_dimension_numbers<[1], [0], [0], [1], [0, 0, 1, 1], [], []>} : vector<32x128xbf16>, vector<128x128xbf16>, vector<32x128xf32> -> vector<32x128xf32>
      %23 = arith.truncf %22 : vector<32x128xf32> to vector<32x128xbf16>
      %c0_21 = arith.constant 0 : index
      %c0_22 = arith.constant 0 : index
      %24 = vector.load %arg8[%c0_21, %c0_22] : memref<32x128xbf16, #tpu.memory_space<vmem>>, vector<32x128xbf16>
      tpu.vector_store %arg8[%c0_21, %c0_22], %23 {strides = array<i32>} : memref<32x128xbf16, #tpu.memory_space<vmem>>, vector<32x128xbf16>,
      %cst_23 = arith.constant 0.000000e+00 : f32
      %25 = vector.broadcast %cst_23 : f32 to vector<128x128xf32>
      %c0_24 = arith.constant 0 : index
      %c0_25 = arith.constant 0 : index
      %26 = vector.load %arg9[%c0_24, %c0_25] : memref<128x128xf32, #tpu.memory_space<vmem>>, vector<128x128xf32>
      tpu.vector_store %arg9[%c0_24, %c0_25], %25 {strides = array<i32>} : memref<128x128xf32, #tpu.memory_space<vmem>>, vector<128x128xf32>,
    } else {
    }
    %c0 = arith.constant 0 : index
    %c0_1 = arith.constant 0 : index
    %3 = vector.load %arg5[%c0, %c0_1] : memref<32x32xbf16, #tpu.memory_space<vmem>>, vector<32x32xbf16>
    %c0_2 = arith.constant 0 : index
    %c0_3 = arith.constant 0 : index
    %4 = vector.load %arg8[%c0_2, %c0_3] : memref<32x128xbf16, #tpu.memory_space<vmem>>, vector<32x128xbf16>
    %cst = arith.constant dense<0.000000e+00> : vector<32x128xf32>
    %5 = tpu.matmul %3, %4, %cst {dimension_numbers = #tpu.dot_dimension_numbers<[1], [0], [0], [1], [0, 0, 1, 1], [], []>} : vector<32x32xbf16>, vector<32x128xbf16>, vector<32x128xf32> -> vector<32x128xf32>
    %c0_4 = arith.constant 0 : index
    %c0_5 = arith.constant 0 : index
    %6 = vector.load %arg3[%c0_4, %c0_5] : memref<1x128xf32, #tpu.memory_space<vmem>>, vector<1x128xf32>
    %7 = vector.broadcast %6 : vector<1x128xf32> to vector<32x128xf32>
    %8 = arith.addf %5, %7 : vector<32x128xf32>
    %cst_6 = arith.constant 0.000000e+00 : f32
    %9 = vector.broadcast %cst_6 : f32 to vector<32x128xf32>
    %10 = arith.maximumf %8, %9 : vector<32x128xf32>
    %c0_7 = arith.constant 0 : index
    %c0_8 = arith.constant 0 : index
    %11 = vector.load %arg9[%c0_7, %c0_8] : memref<128x128xf32, #tpu.memory_space<vmem>>, vector<128x128xf32>
    %c0_9 = arith.constant 0 : index
    %c0_10 = arith.constant 0 : index
    %12 = vector.load %arg6[%c0_9, %c0_10] : memref<128x32xbf16, #tpu.memory_space<vmem>>, vector<128x32xbf16>
    %13 = arith.truncf %10 : vector<32x128xf32> to vector<32x128xbf16>
    %cst_11 = arith.constant dense<0.000000e+00> : vector<128x128xf32>
    %14 = tpu.matmul %12, %13, %cst_11 {dimension_numbers = #tpu.dot_dimension_numbers<[1], [0], [0], [1], [0, 0, 1, 1], [], []>} : vector<128x32xbf16>, vector<32x128xbf16>, vector<128x128xf32> -> vector<128x128xf32>
    %15 = arith.addf %11, %14 : vector<128x128xf32>
    %c0_12 = arith.constant 0 : index
    %c0_13 = arith.constant 0 : index
    %16 = vector.load %arg9[%c0_12, %c0_13] : memref<128x128xf32, #tpu.memory_space<vmem>>, vector<128x128xf32>
    tpu.vector_store %arg9[%c0_12, %c0_13], %15 {strides = array<i32>} : memref<128x128xf32, #tpu.memory_space<vmem>>, vector<128x128xf32>,
    %c0_i32_14 = arith.constant 0 : i32
    %17 = arith.cmpi eq, %arg0, %c0_i32_14 : i32
    %18 = arith.extui %17 : i1 to i32
    %c0_i32_15 = arith.constant 0 : i32
    %19 = arith.cmpi ne, %18, %c0_i32_15 : i32
    scf.if %19 {
      %c0_16 = arith.constant 0 : index
      %c0_17 = arith.constant 0 : index
      %20 = vector.load %arg9[%c0_16, %c0_17] : memref<128x128xf32, #tpu.memory_space<vmem>>, vector<128x128xf32>
      %c0_18 = arith.constant 0 : index
      %c0_19 = arith.constant 0 : index
      %21 = vector.load %arg4[%c0_18, %c0_19] : memref<128x1xf32, #tpu.memory_space<vmem>>, vector<128x1xf32>
      %22 = vector.broadcast %21 : vector<128x1xf32> to vector<128x128xf32>
      %23 = arith.mulf %20, %22 : vector<128x128xf32>
      %c0_20 = arith.constant 0 : index
      %c0_21 = arith.constant 0 : index
      %24 = vector.load %arg7[%c0_20, %c0_21] : memref<128x128xf32, #tpu.memory_space<vmem>>, vector<128x128xf32>
      tpu.vector_store %arg7[%c0_20, %c0_21], %23 {strides = array<i32>} : memref<128x128xf32, #tpu.memory_space<vmem>>, vector<128x128xf32>,
    } else {
    }
    return
  }
  func.func @transform_0(%arg0: i32) -> (i32, i32) {
    %c0_i32 = arith.constant 0 : i32
    %c0_i32_0 = arith.constant 0 : i32
    %c0_i32_1 = arith.constant 0 : i32
    return %c0_i32, %c0_i32_0 : i32, i32
  }
  func.func @transform_1(%arg0: i32) -> (i32, i32) {
    %c0_i32 = arith.constant 0 : i32
    %c0_i32_0 = arith.constant 0 : i32
    %c0_i32_1 = arith.constant 0 : i32
    return %c0_i32, %c0_i32_0 : i32, i32
  }
  func.func @transform_2(%arg0: i32) -> (i32, i32) {
    %c0_i32 = arith.constant 0 : i32
    %c0_i32_0 = arith.constant 0 : i32
    %c0_i32_1 = arith.constant 0 : i32
    return %c0_i32, %c0_i32_0 : i32, i32
  }
  func.func @transform_3(%arg0: i32) -> (i32, i32) {
    %c0_i32 = arith.constant 0 : i32
    %c0_i32_0 = arith.constant 0 : i32
    %c0_i32_1 = arith.constant 0 : i32
    return %c0_i32, %c0_i32_0 : i32, i32
  }
  func.func @transform_4(%arg0: i32) -> (i32, i32) {
    %c0_i32 = arith.constant 0 : i32
    %c0_i32_0 = arith.constant 0 : i32
    return %arg0, %c0_i32 : i32, i32
  }
  func.func @transform_5(%arg0: i32) -> (i32, i32) {
    %c0_i32 = arith.constant 0 : i32
    %c0_i32_0 = arith.constant 0 : i32
    return %c0_i32, %arg0 : i32, i32
  }
  func.func @transform_6(%arg0: i32) -> (i32, i32) {
    %c0_i32 = arith.constant 0 : i32
    %c0_i32_0 = arith.constant 0 : i32
    %c0_i32_1 = arith.constant 0 : i32
    return %c0_i32, %c0_i32_0 : i32, i32
  }
}

</mosaic_0001>

<bundles_post_ra>
// kernel: tpu_custom_call.1
= control target key start
LH: loop header
LB: loop body
LE: loop exit
PB: predicated region body
PF: predicated region fallthrough
CT: control target
= control target key end

     0   :  { %s976_s0 = inlined_call_operand.vmem [shape: bf16[32,128], index: 0, kind: input, shape index: {}]   ;;  %s977_s1 = inlined_call_operand.vmem [shape: bf16[128,128], index: 1, kind: input, shape index: {}]   ;;  %s978_s2 = inlined_call_operand.vmem [shape: f32[1,128], index: 2, kind: input, shape index: {}]   ;;  %s979_s3 = inlined_call_operand.vmem [shape: f32[128,1], index: 3, kind: input, shape index: {}]   ;;  %s980_s4 = inlined_call_operand.vmem [shape: bf16[32,32], index: 4, kind: input, shape index: {}]   ;;  %s981_s5 = inlined_call_operand.vmem [shape: bf16[128,32], index: 5, kind: input, shape index: {}]   ;;  %s982_s6 = inlined_call_operand.hbm [shape: f32[128,128], index: 6, kind: output, shape index: {}]  }
   0x1   :  { %v760_v0 = vld [vmem:[%s977_s1] sm:$0xff]   ;;  %v761_v1 = vld [vmem:[%s977_s1 + $0x8] sm:$0xff]   ;;  %v762_v2 = vld [vmem:[%s977_s1 + $0x10] sm:$0xff]  }
   0x2   :  { %706 = vmatprep.subr.bf16.mxu0 %v760_v0  ;;  %v763_v3 = vld [vmem:[%s977_s1 + $0x18] sm:$0xff]   ;;  %v768_v4 = vld [vmem:[%s976_s0] sm:$0xff]   ;;  %v765_v6 = vld [vmem:[%s977_s1 + $0x28] sm:$0xff]  }
   0x3   :  { %707 = vmatpush3.bf16.msra.mxu0 %v760_v0  ;;  %v764_v5 = vld [vmem:[%s977_s1 + $0x20] sm:$0xff]   ;;  %722 = vmatprep.mubr.bf16.mxu0 %v768_v4 }
   0x4   :  { %708 = vmatprep.subr.bf16.mxu0 %v761_v1 }
   0x7   :  { %709 = vmatpush3.bf16.msra.mxu0 %v761_v1 }
   0x8   :  { %710 = vmatprep.subr.bf16.mxu0 %v762_v2 }
   0xb   :  { %711 = vmatpush3.bf16.msra.mxu0 %v762_v2 }
   0xc   :  { %712 = vmatprep.subr.bf16.mxu0 %v763_v3 }
   0xf   :  { %713 = vmatpush3.bf16.msra.mxu0 %v763_v3 }
  0x10   :  { %714 = vmatprep.subr.bf16.mxu0 %v764_v5 }
  0x11   :  { %11 = vsyncpa [#allocation5], 0  ;;  %v766_v7 = vld [vmem:[%s977_s1 + $0x30] sm:$0xff]   ;;  %v767_v8 = vld [vmem:[%s977_s1 + $0x38] sm:$0xff]   ;;  %vm201_vm0 = vcmask 261120   ;;  %v804_v21 = vmov 0  }
  0x12   :  { %v769_v9 = vld [vmem:[%s976_s0 + $0x8] sm:$0xff]   ;;  %v770_v10 = vld [vmem:[%s980_s4] sm:$0xff]   ;;  %v509_v19 = vld [vmem:[%s979_s3 + $0x10] sm:$0xff]  ;;  %759 = vset.pattern.permute.xlu1 %v804_v21  ;;  %758 = vset.pattern.permute.xlu0 %v804_v21 }
  0x13   :  { %715 = vmatpush3.bf16.msra.mxu0 %v764_v5  ;;  %730 = vmatprep.mubr.msk.bf16.mxu1 %vm201_vm0, %v770_v10  ;;  %v771_v17 = vld [vmem:[%s980_s4 + $0x8] sm:$0xff]   ;;  %v772_v18 = vld [vmem:[%s981_s5] sm:$0xff]   ;;  %v510_v22 = vld [vmem:[%s979_s3 + $0x18] sm:$0xff] }
  0x14   :  { %716 = vmatprep.subr.bf16.mxu0 %v765_v6  ;;  %v507_v20 = vld [vmem:[%s979_s3] sm:$0xff]  ;;  %535 = vperm.xlu1 %759, %v509_v19   ;;  %v508_v23 = vld [vmem:[%s979_s3 + $0x8] sm:$0xff]  ;;  %v514_v26 = vld [vmem:[%s979_s3 + $0x38] sm:$0xff] }
  0x15   :  { %525 = vperm.xlu0 %758, %v507_v20   ;;  %v512_v24 = vld [vmem:[%s979_s3 + $0x28] sm:$0xff]  ;;  %v511_v25 = vld [vmem:[%s979_s3 + $0x20] sm:$0xff]  ;;  %v513_v27 = vld [vmem:[%s979_s3 + $0x30] sm:$0xff] }
  0x16   :  { %v516_v28 = vld [vmem:[%s979_s3 + $0x48] sm:$0xff]  ;;  %v515_v29 = vld [vmem:[%s979_s3 + $0x40] sm:$0xff]  ;;  %v518_v30 = vld [vmem:[%s979_s3 + $0x58] sm:$0xff] }
  0x17   :  { %717 = vmatpush3.bf16.msra.mxu0 %v765_v6  ;;  %v517_v31 = vld [vmem:[%s979_s3 + $0x50] sm:$0xff]  ;;  %v520_v32 = vld [vmem:[%s979_s3 + $0x68] sm:$0xff]  ;;  %v519_v33 = vld [vmem:[%s979_s3 + $0x60] sm:$0xff] }
  0x18   :  { %718 = vmatprep.subr.bf16.mxu0 %v766_v7  ;;  %540 = vperm.xlu1 %759, %v510_v22   ;;  %v522_v34 = vld [vmem:[%s979_s3 + $0x78] sm:$0xff]  ;;  %v521_v35 = vld [vmem:[%s979_s3 + $0x70] sm:$0xff]  ;;  %v661_v36 = vld [vmem:[%s978_s2] ss:$0 sm:$0xff] }
  0x19   :  { %530 = vperm.xlu0 %758, %v508_v23   ;;  %v773_v51 = vld [vmem:[%s981_s5 + $0x8] sm:$0xff]   ;;  %v774_v52 = vld [vmem:[%s981_s5 + $0x10] sm:$0xff]   ;;  %v775_v53 = vld [vmem:[%s981_s5 + $0x18] sm:$0xff]  }
  0x1a   :  { %v776_v54 = vld [vmem:[%s981_s5 + $0x20] sm:$0xff]   ;;  %v777_v55 = vld [vmem:[%s981_s5 + $0x28] sm:$0xff]   ;;  %v778_v56 = vld [vmem:[%s981_s5 + $0x30] sm:$0xff]  }
  0x1b   :  { %719 = vmatpush3.bf16.msra.mxu0 %v766_v7  ;;  %v779_v57 = vld [vmem:[%s981_s5 + $0x38] sm:$0xff]   ;;  %s805_s5 = smov [#allocation4]  }
  0x1c   :  { %720 = vmatprep.subr.bf16.mxu0 %v767_v8  ;;  %550 = vperm.xlu1 %759, %v512_v24   ;;  %s640_s15 = sshll.u32 %s805_s5, 4  ;;  %s641_s15 = int_to_ptr.vmem [resolvable:$true] %s640_s15 }
  0x1d   :  { %545 = vperm.xlu0 %758, %v511_v25   ;;  %s780_s16 = scalar_lea.vmem %s641_s15, 2048  ;;  %p785_p1 = scmp.lt.s32.totalorder %s641_s15, %s641_s15 }
  0x1e   :  { %p781_p0 = scmp.ne.s32.totalorder %s641_s15, %s780_s16  ;;  %p786_p2 = scmp.lt.s32.totalorder %s780_s16, %s780_s16 }
  0x1f   :  { %721 = vmatpush3.bf16.msra.mxu0 %v767_v8 }
  0x20   :  { %560 = vperm.xlu1 %759, %v514_v26   ;;  %p787_p3 = por %p786_p2, %p785_p1 }
  0x21   :  { %555 = vperm.xlu0 %758, %v513_v27  }
  0x22   :  { %723 = vmatmul.mubr.bf16.vlgmr.msra.gmra.mrb[0].mxu0 %v769_v9  ;;  %p788_p4 = pnand %p787_p3, %p781_p0 }
  0x24   :  { %570 = vperm.xlu1 %759, %v516_v28  }
  0x25   :  { %565 = vperm.xlu0 %758, %v515_v29  }
  0x28   :  { %580 = vperm.xlu1 %759, %v518_v30  }
  0x29   :  { %575 = vperm.xlu0 %758, %v517_v31  }
  0x2c   :  { %590 = vperm.xlu1 %759, %v520_v32  }
  0x2d   :  { %585 = vperm.xlu0 %758, %v519_v33  }
  0x30   :  { %600 = vperm.xlu1 %759, %v522_v34  }
  0x31   :  { %595 = vperm.xlu0 %758, %v521_v35  }
  0x93   :  { %v536_v59 = vpop.permute.xlu1 %535 }
  0x94   :  { %v526_v58 = vpop.permute.xlu0 %525 }
  0x97   :  { %v541_v61 = vpop.permute.xlu1 %540 }
  0x98   :  { %v531_v60 = vpop.permute.xlu0 %530 }
  0x9b   :  { %v551_v63 = vpop.permute.xlu1 %550 }
  0x9c   :  { %v546_v62 = vpop.permute.xlu0 %545 }
  0x9f   :  { %v561_v4 = vpop.permute.xlu1 %560 }
  0xa0   :  { %v556_v0 = vpop.permute.xlu0 %555 }
  0xa4   :  { %v566_v10 = vpop.permute.xlu0 %565 }
  0xa8   :  { %v576_v19 = vpop.permute.xlu0 %575 }
  0xac   :  { %v586_v25 = vpop.permute.xlu0 %585 }
  0xb0   :  { %v596_v32 = vpop.permute.xlu0 %595 }
  0xf5   :  { %v724_v11 = vpop.f32.mrb[0].mxu0 }
  0xf6   :  { %v143_v12 = vpop.f32.mrb[1].mxu0 }
  0xf7   :  { %v725_v13 = vpop.f32.mrb[2].mxu0 }
  0xf8   :  { %v159_v14 = vpack.c.bf16 %v725_v13, %v724_v11  ;;  %v146_v15 = vpop.f32.mrb[3].mxu0  ;;  %v571_v11 = vpop.permute.xlu1 %570 }
  0xf9   :  { %v158_v16 = vpack.c.bf16 %v146_v15, %v143_v12 }
  0xfb   :  { %726 = vmatprep.subr.bf16.mxu1 %v158_v16 }
  0xfc   :  { %727 = vmatpush3.bf16.msra.mxu1 %v158_v16  ;;  %v581_v21 = vpop.permute.xlu1 %580 }
  0xfd   :  { %728 = vmatprep.subr.bf16.mxu1 %v159_v14 }
 0x100   :  { %729 = vmatpush3.bf16.msra.mxu1 %v159_v14  ;;  %v591_v30 = vpop.permute.xlu1 %590 }
 0x103   :  { %731 = vmatmul.mubr.msk.bf16.vlgmr.msra.gmra.mrb[0].mxu1 %vm201_vm0, %v771_v17 }
 0x104   :  { %738 = vmatprep.mubr.msk.bf16.mxu1 %vm201_vm0, %v772_v18 }
 0x1d6   :  { %v732_v37 = vpop.f32.mrb[0].mxu1 }
 0x1d7   :  { %v251_v38 = vadd.f32 %v732_v37, %v661_v36  ;;  %v242_v39 = vpop.f32.mrb[1].mxu1 }
 0x1d8   :  { %v243_v40 = vadd.f32 %v661_v36, %v242_v39  ;;  %v733_v41 = vpop.f32.mrb[2].mxu1 }
 0x1d9   :  { %v254_v42 = vadd.f32 %v733_v41, %v661_v36  ;;  %v245_v43 = vpop.f32.mrb[3].mxu1  ;;  %v259_v45 = vmax.f32 %v251_v38, 0.0 }
 0x1da   :  { %v246_v44 = vadd.f32 %v661_v36, %v245_v43  ;;  %v257_v47 = vmax.f32 %v243_v40, 0.0  ;;  %v601_v36 = vpop.permute.xlu1 %600 }
 0x1db   :  { %v260_v46 = vmax.f32 %v254_v42, 0.0 }
 0x1dc   :  { %v258_v48 = vmax.f32 %v246_v44, 0.0 }
 0x1dd   :  { %v294_v49 = vpack.c.bf16 %v260_v46, %v259_v45 }
 0x1de   :  { %v293_v50 = vpack.c.bf16 %v258_v48, %v257_v47 }
 0x1e0   :  { %734 = vmatprep.subr.bf16.mxu1 %v293_v50 }
 0x1e1   :  { %735 = vmatpush3.bf16.msra.mxu1 %v293_v50 }
 0x1e2   :  { %736 = vmatprep.subr.bf16.mxu1 %v294_v49 }
 0x1e5   :  { %737 = vmatpush3.bf16.msra.mxu1 %v294_v49 }
 0x1e8   :  { %739 = vmatmul.mubr.msk.bf16.vlgmr.msra.gmra.mrb[4].mxu1 %vm201_vm0, %v773_v51 }
 0x1e9   :  { %742 = vmatprep.mubr.msk.bf16.mxu1 %vm201_vm0, %v774_v52 }
 0x1f0   :  { %743 = vmatmul.mubr.msk.bf16.gmra.mrb[8].mxu1 %vm201_vm0, %v775_v53 }
 0x1f1   :  { %746 = vmatprep.mubr.msk.bf16.mxu1 %vm201_vm0, %v776_v54 }
 0x1f8   :  { %747 = vmatmul.mubr.msk.bf16.gmra.mrb[12].mxu1 %vm201_vm0, %v777_v55 }
 0x1f9   :  { %750 = vmatprep.mubr.msk.bf16.mxu1 %vm201_vm0, %v778_v56 }
 0x200   :  { %751 = vmatmul.mubr.msk.bf16.gmra.mrb[16].mxu1 %vm201_vm0, %v779_v57 }
 0x2bb   :  { %v740_v1 = vpop.f32.mrb[4].mxu1 }
 0x2bc   :  { %v605_v2 = vmul.f32 %v740_v1, %v536_v59  ;;  %v393_v3 = vpop.f32.mrb[5].mxu1 }
 0x2bd   :  { %v603_v5 = vmul.f32 %v526_v58, %v393_v3  ;;  %v741_v6 = vpop.f32.mrb[6].mxu1 }
 0x2be   :  { %621 = vst [vmem:[#allocation4 + $0x10] sm:$0xff] %v605_v2  ;;  %v606_v7 = vmul.f32 %v741_v6, %v541_v61  ;;  %v396_v8 = vpop.f32.mrb[7].mxu1 }
 0x2bf   :  { %619 = vst [vmem:[#allocation4] sm:$0xff] %v603_v5  ;;  %v604_v9 = vmul.f32 %v531_v60, %v396_v8 }
 0x2c0   :  { %622 = vst [vmem:[#allocation4 + $0x18] sm:$0xff] %v606_v7 }
 0x2c1   :  { %620 = vst [vmem:[#allocation4 + $0x8] sm:$0xff] %v604_v9 }
 0x2c3   :  { %v744_v12 = vpop.f32.mrb[8].mxu1 }
 0x2c4   :  { %v609_v13 = vmul.f32 %v744_v12, %v556_v0  ;;  %v409_v14 = vpop.f32.mrb[9].mxu1 }
 0x2c5   :  { %v607_v15 = vmul.f32 %v546_v62, %v409_v14  ;;  %v745_v16 = vpop.f32.mrb[10].mxu1 }
 0x2c6   :  { %625 = vst [vmem:[#allocation4 + $0x30] sm:$0xff] %v609_v13  ;;  %v610_v17 = vmul.f32 %v745_v16, %v561_v4  ;;  %v412_v18 = vpop.f32.mrb[11].mxu1 }
 0x2c7   :  { %623 = vst [vmem:[#allocation4 + $0x20] sm:$0xff] %v607_v15  ;;  %v608_v20 = vmul.f32 %v551_v63, %v412_v18 }
 0x2c8   :  { %626 = vst [vmem:[#allocation4 + $0x38] sm:$0xff] %v610_v17 }
 0x2c9   :  { %624 = vst [vmem:[#allocation4 + $0x28] sm:$0xff] %v608_v20 }
 0x2cb   :  { %v748_v22 = vpop.f32.mrb[12].mxu1 }
 0x2cc   :  { %v613_v23 = vmul.f32 %v748_v22, %v576_v19  ;;  %v425_v24 = vpop.f32.mrb[13].mxu1 }
 0x2cd   :  { %v611_v26 = vmul.f32 %v566_v10, %v425_v24  ;;  %v749_v27 = vpop.f32.mrb[14].mxu1 }
 0x2ce   :  { %629 = vst [vmem:[#allocation4 + $0x50] sm:$0xff] %v613_v23  ;;  %v614_v28 = vmul.f32 %v749_v27, %v581_v21  ;;  %v428_v29 = vpop.f32.mrb[15].mxu1 }
 0x2cf   :  { %627 = vst [vmem:[#allocation4 + $0x40] sm:$0xff] %v611_v26  ;;  %v612_v31 = vmul.f32 %v571_v11, %v428_v29 }
 0x2d0   :  { %630 = vst [vmem:[#allocation4 + $0x58] sm:$0xff] %v614_v28 }
 0x2d1   :  { %628 = vst [vmem:[#allocation4 + $0x48] sm:$0xff] %v612_v31 }
 0x2d3   :  { %v752_v33 = vpop.f32.mrb[16].mxu1 }
 0x2d4   :  { %v617_v34 = vmul.f32 %v752_v33, %v596_v32  ;;  %v441_v35 = vpop.f32.mrb[17].mxu1 }
 0x2d5   :  { %v615_v37 = vmul.f32 %v586_v25, %v441_v35  ;;  %v753_v38 = vpop.f32.mrb[18].mxu1 }
 0x2d6   :  { %633 = vst [vmem:[#allocation4 + $0x70] sm:$0xff] %v617_v34  ;;  %v618_v39 = vmul.f32 %v753_v38, %v601_v36  ;;  %v444_v40 = vpop.f32.mrb[19].mxu1 }
 0x2d7   :  { %631 = vst [vmem:[#allocation4 + $0x60] sm:$0xff] %v615_v37  ;;  %v616_v41 = vmul.f32 %v591_v30, %v444_v40 }
 0x2d8   :  { %634 = vst [vmem:[#allocation4 + $0x78] sm:$0xff] %v618_v39 }
 0x2d9   :  { %632 = vst [vmem:[#allocation4 + $0x68] sm:$0xff] %v616_v41 }
 0x2da   :  { %791 = shalt.err (!%p788_p4)
}
 0x2db   :  { %s792_s1 = scalar_lea.hbm %s982_s6, 2048 }
 0x2dc   :  { %p793_p5 = scmp.ne.s32.totalorder %s982_s6, %s792_s1  ;;  %p796_p6 = scmp.lt.u32.totalorder %s792_s1, %s982_s6 }
 0x2de   :  { %p798_p7 = pnand %p796_p6, %p793_p5 }
 0x2e0   :  { %801 = shalt.err (!%p798_p7)
}
 0x2e1   :  { %s806_s22 = smov 128   ;;  %s807_s23 = smov 8  }
 0x2e2   :  { %646 = dma.vmem_to_hbm [thread:$0]  %s641_s15, 2048, %s982_s6, [#allocation5], %s806_s22, %s806_s22, %s807_s23  }
 0x2e3   :  { %802 = dma.done.wait [#allocation5], 2048  }
 0x2e4   :  { %803 = vsyncadd [#allocation5], 4294965248 }
 0x2e5   :  { %650 = vsyncpa [#allocation5], 1 }

</bundles_post_ra>
